<compile_context>
chip_gen: v7x
topology: tpu7x:2x2x1
jax: 0.10.0
libtpu: 0.0.40
codegen_flags: <defaults>
</compile_context>

<pallas_src>
import functools
import math

import jax
import jax.numpy as jnp
from jax.experimental import pallas as pl
from jax.experimental.pallas import tpu as pltpu


# ----------------------------------------------------------------------------
# Pass 1: per-lane sum and sum-of-squares over the row axis.
# Grid = (n_split, g_inner); outer axis is "parallel" (megacore), inner axis
# is the sequential reduction.  Each split writes its own (1, 2, Cf) partial.
# ----------------------------------------------------------------------------
def _bn_reduce_kernel(x_ref, psums_ref, acc_s_ref, acc_q_ref, *, rows8):
    i = pl.program_id(1)

    @pl.when(i == 0)
    def _():
        acc_s_ref[...] = jnp.zeros_like(acc_s_ref)
        acc_q_ref[...] = jnp.zeros_like(acc_q_ref)

    x = x_ref[...].astype(jnp.float32)          # (TM, Cf)
    xr = x.reshape(rows8, 8, x.shape[-1])       # keep 8 sublanes of partials
    acc_s_ref[...] += jnp.sum(xr, axis=0)       # (8, Cf) full-tile adds
    acc_q_ref[...] += jnp.sum(xr * xr, axis=0)

    @pl.when(i == pl.num_programs(1) - 1)
    def _():
        s = jnp.sum(acc_s_ref[...], axis=0, keepdims=True)   # (1, Cf)
        q = jnp.sum(acc_q_ref[...], axis=0, keepdims=True)   # (1, Cf)
        psums_ref[...] = jnp.concatenate([s, q], axis=0)[None]   # single store


# ----------------------------------------------------------------------------
# Pass 2: out = x * scale + shift with per-lane (channel-tiled) scale/shift.
# ----------------------------------------------------------------------------
def _bn_apply_kernel(x_ref, scale_ref, shift_ref, o_ref):
    x = x_ref[...].astype(jnp.float32)
    o_ref[...] = (x * scale_ref[...] + shift_ref[...]).astype(o_ref.dtype)


def _pick_fold(m, c):
    """Smallest k with (k*c) % 128 == 0 and m % k == 0 (else 1)."""
    if c % 128 == 0:
        return 1
    k = 128 // math.gcd(c, 128)
    return k if (m % k == 0) else 1


def _pick_row_tile(m_pad, c_lanes, sublane, *, max_rows=2048,
                   bytes_budget=2 * 1024 * 1024):
    """Largest sublane-aligned divisor of m_pad, capped by rows and VMEM bytes."""
    cap = min(max_rows, m_pad, max(sublane, bytes_budget // (c_lanes * 4)))
    cap -= cap % sublane
    cap = max(cap, sublane)
    t = cap
    while t >= sublane:
        if m_pad % t == 0:
            return t
        t -= sublane
    return sublane


def batchnorm_forward(x, gamma, beta, *, eps=1e-5):
    """x: (N, L, C); gamma/beta: (C,). Returns (N, L, C) normalized like
    torch.nn.BatchNorm1d(C) in training mode applied over the channel axis."""
    N, L, C = x.shape
    M = N * L
    itemsize = jnp.dtype(x.dtype).itemsize
    sublane = {4: 8, 2: 16, 1: 32}.get(itemsize, 8)

    # ---- lane-dense fold: (M, C) -> (Mf, Cf) with Cf a multiple of 128 -----
    k = _pick_fold(M, C)
    Mf, Cf = M // k, C * k
    xf = x.reshape(Mf, Cf)

    # ---- pad rows to a sublane multiple (zeros: no effect on the sums) -----
    Mp = ((Mf + sublane - 1) // sublane) * sublane
    if Mp != Mf:
        xf = jnp.pad(xf, ((0, Mp - Mf), (0, 0)))

    TM = _pick_row_tile(Mp, Cf, sublane)
    G = Mp // TM
    n_split = 2 if (G >= 2 and G % 2 == 0) else 1   # use both TCs on megacore
    g_inner = G // n_split

    # ---- pass 1: reduction -------------------------------------------------
    reduce_kernel = functools.partial(_bn_reduce_kernel, rows8=TM // 8)
    psums = pl.pallas_call(
        reduce_kernel,
        out_shape=jax.ShapeDtypeStruct((n_split, 2, Cf), jnp.float32),
        grid_spec=pltpu.PrefetchScalarGridSpec(
            num_scalar_prefetch=0,
            grid=(n_split, g_inner),
            in_specs=[pl.BlockSpec((TM, Cf),
                                   lambda s, i: (s * g_inner + i, 0))],
            out_specs=pl.BlockSpec((1, 2, Cf), lambda s, i: (s, 0, 0)),
            scratch_shapes=[pltpu.VMEM((8, Cf), jnp.float32),
                            pltpu.VMEM((8, Cf), jnp.float32)]),
        compiler_params=pltpu.CompilerParams(
            dimension_semantics=("parallel", "arbitrary")),
        cost_estimate=pl.CostEstimate(
            flops=3 * Mp * Cf,
            transcendentals=0,
            bytes_accessed=Mp * Cf * itemsize + n_split * 2 * Cf * 4),
    )(xf)

    # ---- tiny epilogue: combine splits, fold lane groups, scale/shift ------
    sums = psums.sum(axis=0).reshape(2, k, C).sum(axis=1)        # (2, C)
    count = jnp.float32(M)
    mean = sums[0] / count
    # E[x^2]-E[x]^2 can cancel; clamp so rsqrt never sees a negative value.
    var = jnp.maximum(sums[1] / count - mean * mean, 0.0)        # biased var
    inv_std = jax.lax.rsqrt(var + jnp.float32(eps))
    scale = gamma.astype(jnp.float32) * inv_std                  # (C,)
    shift = beta.astype(jnp.float32) - mean * scale              # (C,)
    scale_f = jnp.tile(scale, (k,)).reshape(1, Cf)
    shift_f = jnp.tile(shift, (k,)).reshape(1, Cf)

    # ---- pass 2: normalize ---------------------------------------------------
    out_flat = pl.pallas_call(
        _bn_apply_kernel,
        out_shape=jax.ShapeDtypeStruct((Mp, Cf), x.dtype),
        grid_spec=pltpu.PrefetchScalarGridSpec(
            num_scalar_prefetch=0,
            grid=(G,),
            in_specs=[pl.BlockSpec((TM, Cf), lambda i: (i, 0)),   # x tile
                      pl.BlockSpec((1, Cf), lambda i: (0, 0)),    # scale
                      pl.BlockSpec((1, Cf), lambda i: (0, 0))],   # shift
            out_specs=pl.BlockSpec((TM, Cf), lambda i: (i, 0))),
        compiler_params=pltpu.CompilerParams(
            dimension_semantics=("parallel",)),
        cost_estimate=pl.CostEstimate(
            flops=2 * Mp * Cf,
            transcendentals=0,
            bytes_accessed=2 * Mp * Cf * itemsize + 2 * Cf * 4),
    )(xf, scale_f, shift_f)

    return out_flat[:Mf].reshape(M, C).reshape(N, L, C)
    # TODO(synk): running_mean/running_var buffer updates of BatchNorm1d are
    # not returned by the PyTorch forward and are therefore not materialized.


def _reference(x, gamma, beta, eps=1e-5):
    mean = jnp.mean(x, axis=(0, 1), keepdims=True)
    var = jnp.mean((x - mean) ** 2, axis=(0, 1), keepdims=True)  # biased
    return (x - mean) * jax.lax.rsqrt(var + eps) * gamma + beta


if __name__ == "__main__":
    N, L, C = 2, 8, 32      # (batch, seq, nfeatures)
    key = jax.random.PRNGKey(0)
    x = jax.random.normal(key, (N, L, C), dtype=jnp.float32)

    gamma = jnp.ones((C,), dtype=jnp.float32)   # BatchNorm1d weight default
    beta = jnp.zeros((C,), dtype=jnp.float32)   # BatchNorm1d bias default

    out = jax.block_until_ready(batchnorm_forward(x, gamma, beta))

    ref = _reference(x, gamma, beta)
    assert out.shape == (N, L, C)
    assert jnp.allclose(out, ref, atol=1e-5, rtol=1e-5)

    print("KERNEL_OK")
</pallas_src>

<mosaic_0001>
module attributes {stable_mosaic.version = 11 : i64} {
  func.func @_bn_reduce_kernel(%arg0: i32, %arg1: i32, %arg2: memref<8x128xf32, #tpu.memory_space<vmem>>, %arg3: memref<1x2x128xf32, #tpu.memory_space<vmem>>, %arg4: memref<8x128xf32, #tpu.memory_space<vmem>>, %arg5: memref<8x128xf32, #tpu.memory_space<vmem>>) attributes {dimension_semantics = [#tpu.dimension_semantics<parallel>, #tpu.dimension_semantics<arbitrary>], iteration_bounds = array<i64: 1, 1>, scalar_prefetch = 0 : i64, scratch_operands = 2 : i64, tpu.core_type = #tpu.core_type<tc>, window_params = [{transform_indices = @transform_0, window_bounds = array<i64: 8, 128>}, {transform_indices = @transform_1, window_bounds = array<i64: 1, 2, 128>}]} {
    %c0_i32 = arith.constant 0 : i32
    %0 = arith.cmpi eq, %arg1, %c0_i32 : i32
    %1 = arith.extui %0 : i1 to i32
    %c0_i32_0 = arith.constant 0 : i32
    %2 = arith.cmpi ne, %1, %c0_i32_0 : i32
    scf.if %2 {
      %cst_13 = arith.constant 0.000000e+00 : f32
      %17 = vector.broadcast %cst_13 : f32 to vector<8x128xf32>
      %c0_14 = arith.constant 0 : index
      %c0_15 = arith.constant 0 : index
      %18 = vector.load %arg4[%c0_14, %c0_15] : memref<8x128xf32, #tpu.memory_space<vmem>>, vector<8x128xf32>
      tpu.vector_store %arg4[%c0_14, %c0_15], %17 {strides = array<i32>} : memref<8x128xf32, #tpu.memory_space<vmem>>, vector<8x128xf32>,
      %cst_16 = arith.constant 0.000000e+00 : f32
      %19 = vector.broadcast %cst_16 : f32 to vector<8x128xf32>
      %c0_17 = arith.constant 0 : index
      %c0_18 = arith.constant 0 : index
      %20 = vector.load %arg5[%c0_17, %c0_18] : memref<8x128xf32, #tpu.memory_space<vmem>>, vector<8x128xf32>
      tpu.vector_store %arg5[%c0_17, %c0_18], %19 {strides = array<i32>} : memref<8x128xf32, #tpu.memory_space<vmem>>, vector<8x128xf32>,
    } else {
    }
    %c0 = arith.constant 0 : index
    %c0_1 = arith.constant 0 : index
    %3 = vector.load %arg2[%c0, %c0_1] : memref<8x128xf32, #tpu.memory_space<vmem>>, vector<8x128xf32>
    %4 = vector.shape_cast %3 : vector<8x128xf32> to vector<1x8x128xf32>
    %c0_2 = arith.constant 0 : index
    %c0_3 = arith.constant 0 : index
    %5 = vector.load %arg4[%c0_2, %c0_3] : memref<8x128xf32, #tpu.memory_space<vmem>>, vector<8x128xf32>
    %cst = arith.constant dense<0.000000e+00> : vector<8x128xf32>
    %6 = vector.multi_reduction <add>, %4, %cst [0] : vector<1x8x128xf32> to vector<8x128xf32>
    %7 = arith.addf %5, %6 : vector<8x128xf32>
    %c0_4 = arith.constant 0 : index
    %c0_5 = arith.constant 0 : index
    %8 = vector.load %arg4[%c0_4, %c0_5] : memref<8x128xf32, #tpu.memory_space<vmem>>, vector<8x128xf32>
    tpu.vector_store %arg4[%c0_4, %c0_5], %7 {strides = array<i32>} : memref<8x128xf32, #tpu.memory_space<vmem>>, vector<8x128xf32>,
    %c0_6 = arith.constant 0 : index
    %c0_7 = arith.constant 0 : index
    %9 = vector.load %arg5[%c0_6, %c0_7] : memref<8x128xf32, #tpu.memory_space<vmem>>, vector<8x128xf32>
    %10 = arith.mulf %4, %4 : vector<1x8x128xf32>
    %cst_8 = arith.constant dense<0.000000e+00> : vector<8x128xf32>
    %11 = vector.multi_reduction <add>, %10, %cst_8 [0] : vector<1x8x128xf32> to vector<8x128xf32>
    %12 = arith.addf %9, %11 : vector<8x128xf32>
    %c0_9 = arith.constant 0 : index
    %c0_10 = arith.constant 0 : index
    %13 = vector.load %arg5[%c0_9, %c0_10] : memref<8x128xf32, #tpu.memory_space<vmem>>, vector<8x128xf32>
    tpu.vector_store %arg5[%c0_9, %c0_10], %12 {strides = array<i32>} : memref<8x128xf32, #tpu.memory_space<vmem>>, vector<8x128xf32>,
    %c0_i32_11 = arith.constant 0 : i32
    %14 = arith.cmpi eq, %arg1, %c0_i32_11 : i32
    %15 = arith.extui %14 : i1 to i32
    %c0_i32_12 = arith.constant 0 : i32
    %16 = arith.cmpi ne, %15, %c0_i32_12 : i32
    scf.if %16 {
      %c0_13 = arith.constant 0 : index
      %c0_14 = arith.constant 0 : index
      %17 = vector.load %arg4[%c0_13, %c0_14] : memref<8x128xf32, #tpu.memory_space<vmem>>, vector<8x128xf32>
      %cst_15 = arith.constant dense<0.000000e+00> : vector<128xf32>
      %18 = vector.multi_reduction <add>, %17, %cst_15 [0] : vector<8x128xf32> to vector<128xf32>
      %19 = vector.shape_cast %18 : vector<128xf32> to vector<1x128xf32>
      %c0_16 = arith.constant 0 : index
      %c0_17 = arith.constant 0 : index
      %20 = vector.load %arg5[%c0_16, %c0_17] : memref<8x128xf32, #tpu.memory_space<vmem>>, vector<8x128xf32>
      %cst_18 = arith.constant dense<0.000000e+00> : vector<128xf32>
      %21 = vector.multi_reduction <add>, %20, %cst_18 [0] : vector<8x128xf32> to vector<128xf32>
      %22 = vector.shape_cast %21 : vector<128xf32> to vector<1x128xf32>
      %23 = tpu.concatenate %19, %22 in 0 : vector<1x128xf32>, vector<1x128xf32> -> vector<2x128xf32>
      %24 = vector.shape_cast %23 : vector<2x128xf32> to vector<1x2x128xf32>
      %c0_19 = arith.constant 0 : index
      %c0_20 = arith.constant 0 : index
      %c0_21 = arith.constant 0 : index
      %25 = vector.load %arg3[%c0_19, %c0_20, %c0_21] : memref<1x2x128xf32, #tpu.memory_space<vmem>>, vector<1x2x128xf32>
      tpu.vector_store %arg3[%c0_19, %c0_20, %c0_21], %24 {strides = array<i32>} : memref<1x2x128xf32, #tpu.memory_space<vmem>>, vector<1x2x128xf32>,
    } else {
    }
    return
  }
  func.func @transform_0(%arg0: i32, %arg1: i32) -> (i32, i32) {
    %c1_i32 = arith.constant 1 : i32
    %0 = arith.muli %arg0, %c1_i32 : i32
    %1 = arith.addi %0, %arg1 : i32
    %c0_i32 = arith.constant 0 : i32
    %c0_i32_0 = arith.constant 0 : i32
    return %1, %c0_i32 : i32, i32
  }
  func.func @transform_1(%arg0: i32, %arg1: i32) -> (i32, i32, i32) {
    %c0_i32 = arith.constant 0 : i32
    %c0_i32_0 = arith.constant 0 : i32
    %c0_i32_1 = arith.constant 0 : i32
    return %arg0, %c0_i32, %c0_i32_0 : i32, i32, i32
  }
}

</mosaic_0001>

<bundles_post_ra>
// kernel: tpu_custom_call.1
= control target key start
LH: loop header
LB: loop body
LE: loop exit
PB: predicated region body
PF: predicated region fallthrough
CT: control target
= control target key end

     0   :  { %6 = vsyncpa [#allocation5], 0  ;;  %s162_s0 = inlined_call_operand.hbm [shape: f32[8,128], index: 0, kind: input, shape index: {}]   ;;  %s163_s1 = inlined_call_operand.hbm [shape: f32[1,2,128], index: 1, kind: output, shape index: {}]  }
   0x1   :  { %7 = vsyncpa [#allocation6], 0  ;;  %s126_s6 = smov [#allocation4]   ;;  %s78_s10 = scalar_lea.hbm %s162_s0, 128 }
   0x2   :  { %s17_s7 = sshll.u32 %s126_s6, 4  ;;  %p79_p0 = scmp.ne.s32.totalorder %s162_s0, %s78_s10  ;;  %s18_s7 = int_to_ptr.vmem [resolvable:$true] %s17_s7 }
   0x3   :  { %p82_p1 = scmp.lt.u32.totalorder %s78_s10, %s162_s0 }
   0x5   :  { %p84_p2 = pnand %p82_p1, %p79_p0 }
   0x7   :  { %87 = shalt.err (!%p84_p2)
}
   0x8   :  { %s88_s15 = scalar_lea.vmem %s18_s7, 128  ;;  %p93_p4 = scmp.lt.s32.totalorder %s18_s7, %s18_s7 }
   0x9   :  { %p89_p3 = scmp.ne.s32.totalorder %s18_s7, %s88_s15  ;;  %p94_p5 = scmp.lt.s32.totalorder %s88_s15, %s88_s15 }
   0xb   :  { %p95_p6 = por %p94_p5, %p93_p4 }
   0xd   :  { %p96_p7 = pnand %p95_p6, %p89_p3 }
   0xf   :  { %99 = shalt.err (!%p96_p7)
}
  0x10   :  { %20 = dma.hbm_to_vmem [thread:$0]  %s162_s0, 128, %s18_s7, [#allocation5]  }
  0x11   :  { %122 = dma.done.wait [#allocation5], 128  }
  0x12   :  { %123 = vsyncadd [#allocation5], 4294967168  ;;  %v31_v0 = vld [vmem:[#allocation4] sm:$0xff]  ;;  %s127_s18 = smov [#allocation7]   ;;  %vm58_vm0 = vcmask 1040384  }
  0x13   :  { %v37_v1 = vmul.f32 %v31_v0, %v31_v0  ;;  %v45_v2 = vrot.slane %v31_v0, 4  ;;  %s67_s19 = sshll.u32 %s127_s18, 4  ;;  %s68_s19 = int_to_ptr.vmem [resolvable:$true] %s67_s19 }
  0x14   :  { %s100_s0 = scalar_lea.vmem %s68_s19, 32  ;;  %p105_p9 = scmp.lt.s32.totalorder %s68_s19, %s68_s19 }
  0x15   :  { %v46_v3 = vadd.f32 %v45_v2, %v31_v0  ;;  %v52_v4 = vrot.slane %v37_v1, 4  ;;  %p101_p8 = scmp.ne.s32.totalorder %s68_s19, %s100_s0  ;;  %p106_p10 = scmp.lt.s32.totalorder %s100_s0, %s100_s0 }
  0x17   :  { %v47_v5 = vrot.slane %v46_v3, 2  ;;  %v53_v6 = vadd.f32 %v52_v4, %v37_v1  ;;  %p107_p11 = por %p106_p10, %p105_p9 }
  0x19   :  { %v48_v7 = vadd.f32 %v47_v5, %v46_v3  ;;  %v54_v8 = vrot.slane %v53_v6, 2  ;;  %p108_p12 = pnand %p107_p11, %p101_p8 }
  0x1b   :  { %v49_v9 = vrot.slane %v48_v7, 1  ;;  %v55_v10 = vadd.f32 %v54_v8, %v53_v6 }
  0x1d   :  { %v50_v11 = vadd.f32 %v49_v9, %v48_v7  ;;  %v56_v12 = vrot.slane %v55_v10, 1 }
  0x1f   :  { %v57_v13 = vadd.f32 %v56_v12, %v55_v10 }
  0x21   :  { %v59_v14 = vsel %vm58_vm0, %v50_v11, %v57_v13 }
  0x22   :  { %60 = vst [vmem:[#allocation7] sm:$0x3] %v59_v14 }
  0x23   :  { %111 = shalt.err (!%p108_p12)
}
  0x24   :  { %s112_s22 = scalar_lea.hbm %s163_s1, 32 }
  0x25   :  { %p113_p13 = scmp.ne.s32.totalorder %s163_s1, %s112_s22  ;;  %p116_p0 = scmp.lt.u32.totalorder %s112_s22, %s163_s1 }
  0x27   :  { %p118_p1 = pnand %p116_p0, %p113_p13 }
  0x29   :  { %121 = shalt.err (!%p118_p1)
}
  0x2a   :  { %70 = dma.vmem_to_hbm [thread:$0]  %s68_s19, 32, %s163_s1, [#allocation6]  }
  0x2b   :  { %124 = dma.done.wait [#allocation6], 32  }
  0x2c   :  { %125 = vsyncadd [#allocation6], 4294967264 }
  0x2d   :  { %74 = vsyncpa [#allocation5], 1 }
  0x2e   :  { %75 = vsyncpa [#allocation6], 1 }

</bundles_post_ra>
